<compile_context>
chip_gen: v7x
topology: tpu7x:2x2x1
jax: 0.10.0
libtpu: 0.0.40
codegen_flags: <defaults>
</compile_context>

<pallas_src>
import functools

import jax
import jax.numpy as jnp
from jax.experimental import pallas as pl
from jax.experimental.pallas import tpu as pltpu

F32 = jnp.float32
FMAX = float(jnp.finfo(jnp.float32).max)   # torch.finfo(float32).max
FEPS = float(jnp.finfo(jnp.float32).eps)   # torch.finfo(float32).eps


def get_negative_mask(batchsize: int, neg=None):
    """Port of utils_loss.get_negative_mask (plain JAX, used by the reference check)."""
    if neg is None or neg >= batchsize - 1:
        return jnp.ones((batchsize, batchsize), dtype=bool)
    identity = jnp.eye(batchsize, dtype=bool)
    mask = identity
    for st in range(1, neg + 1):
        mask = mask | jnp.roll(identity, shift=-st, axis=0)
    return mask


def _conloss_kernel(inv_temp, n_planes,
                    bi_ref, x_ref, pconf_ref, xm_ref,
                    logit_ref, score_ref, num_ref,
                    m_sc, l_sc):
    """One grid step == one (b1 row, valid b2 plane) pair.

    bi_ref    : (b,) int32 SMEM   scalar-prefetched batch_index (only used by index_maps)
    x_ref     : (1, 1, Q, K)      output[b1, plane] in native layout (any float dtype)
    pconf_ref : (1, Q, K)         confidence[batch_index[b1]] (gathered by index_map)
    xm_ref    : (1, Q, K) int8    x_mask[b1]
    logit_ref : (1, Q, K) f32     x-masked log-softmax logit (as returned in the dict)
    score_ref : (1, Q, K) f32     softmax_k of masked logit, zeroed outside x_mask
    num_ref   : (1, 1, 1) f32     -(pseudo_target * logit).sum() for this row
    m_sc,l_sc : (Q, 1) f32        running max / running sum of the online log-sum-exp
    """
    j = pl.program_id(1)

    # this plane, scaled with a multiply (no divide); upcast if the input is bf16
    x = x_ref[0, 0].astype(F32) * inv_temp                        # (Q, K)

    @pl.when(j == 0)
    def _():
        m_sc[...] = jnp.full_like(m_sc, -jnp.inf)
        l_sc[...] = jnp.zeros_like(l_sc)

    # online (streaming) log-sum-exp over (valid b2 planes, k).  Only valid planes are
    # ever DMA'd (plane skipping), so no negative-mask / -FMAX fill is needed at all.
    m_prev = m_sc[...]                                            # (Q, 1)
    m_new = jnp.maximum(m_prev, jnp.max(x, axis=-1, keepdims=True))
    alpha = jnp.exp(m_prev - m_new)
    l_sc[...] = alpha * l_sc[...] + jnp.sum(jnp.exp(x - m_new), axis=-1, keepdims=True)
    m_sc[...] = m_new

    @pl.when(j == n_planes - 1)
    def _():
        # planes are ordered so the diagonal (b2 == b1) arrives last: it is the block
        # already resident in x (scaled) — no scratch copy, no re-read, no re-scale.
        diag = x                                                  # (Q, K)
        shift = m_sc[...] + jnp.log(l_sc[...])                    # (Q, 1)
        logit = diag - shift                                      # (Q, K) unmasked log-softmax

        xm = xm_ref[0].astype(F32) > 0.0                          # (Q, K) bool (int8 input)
        pt = jnp.where(xm, pconf_ref[0].astype(F32), 0.0)         # pseudo_target.masked_fill_

        # loss numerator fully reduced to one scalar per b1 row (uses the UNMASKED logit,
        # exactly like the reference: the -FMAX fill happens after the loss in torch)
        num_ref[0] = -jnp.sum(jnp.sum(pt * logit, axis=1, keepdims=True),
                              axis=0, keepdims=True)              # (1, 1)

        # reference masks `logit` in place before returning it
        logit_ref[0] = jnp.where(xm, logit, -FMAX)

        # conf = softmax_k(masked logit); softmax is shift-invariant, so compute it from
        # the x-masked scaled diagonal directly.  Exact division (score is returned to
        # the caller, not only argmax'ed).
        diag_m = jnp.where(xm, diag, -FMAX)
        m2 = jnp.max(diag_m, axis=-1, keepdims=True)
        e2 = jnp.exp(diag_m - m2)
        s2 = jnp.sum(e2, axis=-1, keepdims=True)
        score_ref[0] = jnp.where(xm, e2 / s2, 0.0)


def conloss_forward(output4d, confidence, batch_index, x_mask, *,
                    temperature=0.07, base_temperature=1.0,
                    conf_ema_m=0.99, hard=True, neg_num=None, update_conf=True,
                    return_atten=True):
    b, b2_, Q, K = output4d.shape
    assert b == b2_, "output must be (b, b, q, k)"
    N, Qc, Kc = confidence.shape
    assert (Qc, Kc) == (Q, K)

    inv_temp = 1.0 / float(temperature)
    use_neg = (neg_num is not None) and (neg_num < b - 1)
    n_planes = (int(neg_num) + 1) if use_neg else b

    bi = batch_index.astype(jnp.int32)
    xm_i8 = x_mask.astype(jnp.int8)                 # 4x smaller mask DMA than f32

    kernel = functools.partial(_conloss_kernel, inv_temp, n_planes)

    # b2 plane visited at step (i, j): negatives first, diagonal (b2 == b1) last.
    # Valid planes for row i are {i, i+1, ..., i+neg_num} mod b.
    def x_map(i, j, bi_ref):
        return (i, (i + (j + 1) % n_planes) % b, 0, 0)

    def conf_map(i, j, bi_ref):
        return (bi_ref[i], 0, 0)                    # fused confidence gather

    def row_map(i, j, bi_ref):
        return (i, 0, 0)

    # VMEM budget: only single (Q,K) planes are streamed now, so the footprint is tiny.
    x_item = jnp.dtype(output4d.dtype).itemsize
    c_item = jnp.dtype(confidence.dtype).itemsize
    step_bytes = Q * K * (2 * x_item + 2 * c_item + 2 * 1   # double-buffered inputs
                          + 4 * 4)                          # resident f32 output blocks
    step_bytes += 2 * Q * 128 * 4                           # m/l scratch (lane-padded)
    vmem_limit = int(min(max(2 * step_bytes + (1 << 20), 4 << 20), 32 << 20))

    logit, score, num = pl.pallas_call(
        kernel,
        out_shape=(
            jax.ShapeDtypeStruct((b, Q, K), F32),
            jax.ShapeDtypeStruct((b, Q, K), F32),
            jax.ShapeDtypeStruct((b, 1, 1), F32),
        ),
        grid_spec=pltpu.PrefetchScalarGridSpec(
            num_scalar_prefetch=1,
            grid=(b, n_planes),
            in_specs=[
                pl.BlockSpec((1, 1, Q, K), x_map),       # output[b1, plane], native layout
                pl.BlockSpec((1, Q, K), conf_map),       # confidence[batch_index[b1]]
                pl.BlockSpec((1, Q, K), row_map),        # x_mask[b1] (int8)
            ],
            out_specs=[
                pl.BlockSpec((1, Q, K), row_map),
                pl.BlockSpec((1, Q, K), row_map),
                pl.BlockSpec((1, 1, 1), row_map),
            ],
            scratch_shapes=[
                pltpu.VMEM((Q, 1), F32),                 # running max
                pltpu.VMEM((Q, 1), F32),                 # running sum
            ],
        ),
        compiler_params=pltpu.CompilerParams(
            dimension_semantics=("parallel", "arbitrary"),   # rows parallel, planes reduce
            vmem_limit_bytes=vmem_limit,
        ),
    )(bi, output4d, confidence, xm_i8)

    # scalar normalization (glue)
    phrase_mask = x_mask[:, :, 0]
    loss = num.reshape(b).sum() / (phrase_mask.sum().astype(F32) + FEPS)
    loss = loss * base_temperature

    # pseudo-target for aux + confidence EMA update (torch.no_grad glue)
    pt_gather = confidence[bi].astype(F32)
    target = jnp.where(x_mask, pt_gather, 0.0)

    new_confidence = confidence
    if update_conf:
        if hard:
            temp_conf = jax.nn.one_hot(jnp.argmax(score, axis=-1), K, dtype=F32)
        else:
            temp_conf = score
        temp_conf = jnp.where(x_mask, temp_conf, 0.0)
        upd = conf_ema_m * pt_gather + (1.0 - conf_ema_m) * temp_conf
        new_confidence = confidence.at[bi].set(upd.astype(confidence.dtype))

    atten = None
    if return_atten:
        # TODO(synk): with plane skipping the kernel never touches the masked-out b2
        # planes, so the full rearranged attention map has to be built outside (only
        # paid when the caller asks for it).
        atten = (jnp.transpose(output4d, (0, 2, 1, 3)).reshape(b, Q, b * K).astype(F32)
                 * jnp.float32(inv_temp))

    aux = {"loss": loss, "atten": atten, "logit": logit,
           "target": target, "score": score, "temperature": temperature}
    return loss, aux, new_confidence


def conloss_reference(output4d, confidence, batch_index, x_mask,
                      temperature, base_temperature, neg_num):
    """Pure-JAX reference (direct translation of the PyTorch forward) for checking."""
    b, _, Q, K = output4d.shape
    out = output4d.astype(F32) / temperature
    neg_mask = get_negative_mask(b, neg_num)
    nm = jnp.repeat(neg_mask, K, axis=1)[:, None, :]                     # (b, 1, b*K)
    x = jnp.transpose(out, (0, 2, 1, 3)).reshape(b, Q, b * K)
    xmask = jnp.where(nm, x, -FMAX)
    maxv = jnp.max(xmask, axis=-1, keepdims=True)
    lse = jnp.log(jnp.sum(jnp.exp(xmask - maxv), axis=-1, keepdims=True))
    lsm = xmask - maxv - lse
    lsm4 = jnp.transpose(lsm.reshape(b, Q, b, K), (0, 2, 1, 3))
    logit = lsm4[jnp.arange(b), jnp.arange(b)]                           # (b, Q, K)
    pt = confidence[batch_index].astype(F32) * x_mask
    num = -(pt * logit).sum(-1)
    loss = num.sum() / (x_mask[:, :, 0].sum().astype(F32) + FEPS) * base_temperature
    logit_m = jnp.where(x_mask, logit, -FMAX)
    conf = jax.nn.softmax(logit_m, axis=-1) * x_mask
    return loss, logit_m, conf


if __name__ == "__main__":
    B, Q, K, N = 4, 8, 32, 8        # batch, queries, keys, confidence-pool size
    NEG_NUM = 2
    TEMP, BASE_TEMP = 0.07, 1.0

    key = jax.random.PRNGKey(0)
    k1, k2 = jax.random.split(key, 2)
    output = jax.random.normal(k1, (B, B, Q, K), dtype=F32)
    confidence = jax.nn.softmax(jax.random.normal(k2, (N, Q, K), dtype=F32), axis=-1)
    batch_index = jnp.arange(B, dtype=jnp.int32)

    # deterministic per-sample valid-length mask (phrase q / region k existence)
    q_valid = jnp.array([8, 6, 4, 8])
    k_valid = jnp.array([32, 20, 32, 16])
    qi = jnp.arange(Q)[None, :, None]
    ki = jnp.arange(K)[None, None, :]
    x_mask = (qi < q_valid[:, None, None]) & (ki < k_valid[:, None, None])   # (B, Q, K) bool

    # --- path 1: limited negatives (plane-skipping: only neg_num+1 planes per row) ---
    loss, aux, new_conf = conloss_forward(
        output, confidence, batch_index, x_mask,
        temperature=TEMP, base_temperature=BASE_TEMP,
        conf_ema_m=0.99, hard=True, neg_num=NEG_NUM, update_conf=True,
        return_atten=False)
    jax.block_until_ready((loss, aux["logit"], aux["score"], new_conf))

    ref_loss, ref_logit, ref_conf = conloss_reference(
        output, confidence, batch_index, x_mask, TEMP, BASE_TEMP, NEG_NUM)

    assert jnp.allclose(loss, ref_loss, rtol=1e-3, atol=1e-3), (loss, ref_loss)
    assert jnp.allclose(aux["logit"], ref_logit, rtol=1e-3, atol=1e-3)
    assert jnp.allclose(aux["score"], ref_conf, rtol=2e-3, atol=2e-3)
    assert jnp.array_equal(jnp.argmax(aux["score"], -1), jnp.argmax(ref_conf, -1))

    # --- path 2: full negative set (neg_num=None -> all b planes streamed) ---
    loss2, aux2, _ = conloss_forward(
        output, confidence, batch_index, x_mask,
        temperature=TEMP, base_temperature=BASE_TEMP,
        conf_ema_m=0.99, hard=True, neg_num=None, update_conf=False,
        return_atten=False)
    jax.block_until_ready((loss2, aux2["logit"], aux2["score"]))

    ref_loss2, ref_logit2, ref_conf2 = conloss_reference(
        output, confidence, batch_index, x_mask, TEMP, BASE_TEMP, None)

    assert jnp.allclose(loss2, ref_loss2, rtol=1e-3, atol=1e-3), (loss2, ref_loss2)
    assert jnp.allclose(aux2["logit"], ref_logit2, rtol=1e-3, atol=1e-3)
    assert jnp.allclose(aux2["score"], ref_conf2, rtol=2e-3, atol=2e-3)

    print("KERNEL_OK")
</pallas_src>

<mosaic_0001>
module attributes {stable_mosaic.version = 11 : i64} {
  func.func @_conloss_kernel(%arg0: i32, %arg1: i32, %arg2: memref<4xi32, #tpu.memory_space<smem>>, %arg3: memref<1x1x8x32xf32, #tpu.memory_space<vmem>>, %arg4: memref<1x8x32xf32, #tpu.memory_space<vmem>>, %arg5: memref<1x8x32xi8, #tpu.memory_space<vmem>>, %arg6: memref<1x8x32xf32, #tpu.memory_space<vmem>>, %arg7: memref<1x8x32xf32, #tpu.memory_space<vmem>>, %arg8: memref<1x1x1xf32, #tpu.memory_space<vmem>>, %arg9: memref<8x1xf32, #tpu.memory_space<vmem>>, %arg10: memref<8x1xf32, #tpu.memory_space<vmem>>) attributes {dimension_semantics = [#tpu.dimension_semantics<parallel>, #tpu.dimension_semantics<arbitrary>], iteration_bounds = array<i64: 4, 3>, scalar_prefetch = 1 : i64, scratch_operands = 2 : i64, tpu.core_type = #tpu.core_type<tc>, window_params = [{transform_indices = @transform_0, window_bounds = array<i64: 1, 1, 8, 32>}, {transform_indices = @transform_1, window_bounds = array<i64: 1, 8, 32>}, {transform_indices = @transform_2, window_bounds = array<i64: 1, 8, 32>}, {transform_indices = @transform_3, window_bounds = array<i64: 1, 8, 32>}, {transform_indices = @transform_4, window_bounds = array<i64: 1, 8, 32>}, {transform_indices = @transform_5, window_bounds = array<i64: 1, 1, 1>}]} {
    %c0 = arith.constant 0 : index
    %c0_0 = arith.constant 0 : index
    %c0_1 = arith.constant 0 : index
    %c0_2 = arith.constant 0 : index
    %0 = vector.load %arg3[%c0, %c0_0, %c0_1, %c0_2] : memref<1x1x8x32xf32, #tpu.memory_space<vmem>>, vector<1x1x8x32xf32>
    %1 = vector.shape_cast %0 : vector<1x1x8x32xf32> to vector<8x32xf32>
    %cst = arith.constant 14.2857141 : f32
    %2 = vector.broadcast %cst : f32 to vector<8x32xf32>
    %3 = arith.mulf %1, %2 : vector<8x32xf32>
    %c0_i32 = arith.constant 0 : i32
    %4 = arith.cmpi eq, %arg1, %c0_i32 : i32
    %5 = arith.extui %4 : i1 to i32
    %c0_i32_3 = arith.constant 0 : i32
    %6 = arith.cmpi ne, %5, %c0_i32_3 : i32
    scf.if %6 {
      %cst_15 = arith.constant 0xFF800000 : f32
      %26 = vector.broadcast %cst_15 : f32 to vector<8x1xf32>
      %c0_16 = arith.constant 0 : index
      %c0_17 = arith.constant 0 : index
      %27 = vector.load %arg9[%c0_16, %c0_17] : memref<8x1xf32, #tpu.memory_space<vmem>>, vector<8x1xf32>
      tpu.vector_store %arg9[%c0_16, %c0_17], %26 {strides = array<i32>} : memref<8x1xf32, #tpu.memory_space<vmem>>, vector<8x1xf32>,
      %cst_18 = arith.constant 0.000000e+00 : f32
      %28 = vector.broadcast %cst_18 : f32 to vector<8x1xf32>
      %c0_19 = arith.constant 0 : index
      %c0_20 = arith.constant 0 : index
      %29 = vector.load %arg10[%c0_19, %c0_20] : memref<8x1xf32, #tpu.memory_space<vmem>>, vector<8x1xf32>
      tpu.vector_store %arg10[%c0_19, %c0_20], %28 {strides = array<i32>} : memref<8x1xf32, #tpu.memory_space<vmem>>, vector<8x1xf32>,
    } else {
    }
    %c0_4 = arith.constant 0 : index
    %c0_5 = arith.constant 0 : index
    %7 = vector.load %arg9[%c0_4, %c0_5] : memref<8x1xf32, #tpu.memory_space<vmem>>, vector<8x1xf32>
    %cst_6 = arith.constant dense<0xFF800000> : vector<8xf32>
    %8 = vector.multi_reduction <maximumf>, %3, %cst_6 [1] : vector<8x32xf32> to vector<8xf32>
    %9 = vector.shape_cast %8 : vector<8xf32> to vector<8x1xf32>
    %10 = arith.maximumf %7, %9 : vector<8x1xf32>
    %11 = arith.subf %7, %10 : vector<8x1xf32>
    %12 = math.exp %11 : vector<8x1xf32>
    %c0_7 = arith.constant 0 : index
    %c0_8 = arith.constant 0 : index
    %13 = vector.load %arg10[%c0_7, %c0_8] : memref<8x1xf32, #tpu.memory_space<vmem>>, vector<8x1xf32>
    %14 = arith.mulf %12, %13 : vector<8x1xf32>
    %15 = vector.broadcast %10 : vector<8x1xf32> to vector<8x32xf32>
    %16 = arith.subf %3, %15 : vector<8x32xf32>
    %17 = math.exp %16 : vector<8x32xf32>
    %cst_9 = arith.constant dense<0.000000e+00> : vector<8xf32>
    %18 = vector.multi_reduction <add>, %17, %cst_9 [1] : vector<8x32xf32> to vector<8xf32>
    %19 = vector.shape_cast %18 : vector<8xf32> to vector<8x1xf32>
    %20 = arith.addf %14, %19 : vector<8x1xf32>
    %c0_10 = arith.constant 0 : index
    %c0_11 = arith.constant 0 : index
    %21 = vector.load %arg10[%c0_10, %c0_11] : memref<8x1xf32, #tpu.memory_space<vmem>>, vector<8x1xf32>
    tpu.vector_store %arg10[%c0_10, %c0_11], %20 {strides = array<i32>} : memref<8x1xf32, #tpu.memory_space<vmem>>, vector<8x1xf32>,
    %c0_12 = arith.constant 0 : index
    %c0_13 = arith.constant 0 : index
    %22 = vector.load %arg9[%c0_12, %c0_13] : memref<8x1xf32, #tpu.memory_space<vmem>>, vector<8x1xf32>
    tpu.vector_store %arg9[%c0_12, %c0_13], %10 {strides = array<i32>} : memref<8x1xf32, #tpu.memory_space<vmem>>, vector<8x1xf32>,
    %c2_i32 = arith.constant 2 : i32
    %23 = arith.cmpi eq, %arg1, %c2_i32 : i32
    %24 = arith.extui %23 : i1 to i32
    %c0_i32_14 = arith.constant 0 : i32
    %25 = arith.cmpi ne, %24, %c0_i32_14 : i32
    scf.if %25 {
      %c0_15 = arith.constant 0 : index
      %c0_16 = arith.constant 0 : index
      %26 = vector.load %arg9[%c0_15, %c0_16] : memref<8x1xf32, #tpu.memory_space<vmem>>, vector<8x1xf32>
      %c0_17 = arith.constant 0 : index
      %c0_18 = arith.constant 0 : index
      %27 = vector.load %arg10[%c0_17, %c0_18] : memref<8x1xf32, #tpu.memory_space<vmem>>, vector<8x1xf32>
      %28 = math.log %27 : vector<8x1xf32>
      %29 = arith.addf %26, %28 : vector<8x1xf32>
      %30 = vector.broadcast %29 : vector<8x1xf32> to vector<8x32xf32>
      %31 = arith.subf %3, %30 : vector<8x32xf32>
      %c0_19 = arith.constant 0 : index
      %c0_20 = arith.constant 0 : index
      %c0_21 = arith.constant 0 : index
      %32 = vector.load %arg5[%c0_19, %c0_20, %c0_21] : memref<1x8x32xi8, #tpu.memory_space<vmem>>, vector<1x8x32xi8>
      %33 = vector.shape_cast %32 : vector<1x8x32xi8> to vector<8x32xi8>
      %34 = arith.sitofp %33 : vector<8x32xi8> to vector<8x32xf32>
      %cst_22 = arith.constant 0.000000e+00 : f32
      %35 = vector.broadcast %cst_22 : f32 to vector<8x32xf32>
      %36 = arith.cmpf ogt, %34, %35 : vector<8x32xf32>
      %c0_23 = arith.constant 0 : index
      %c0_24 = arith.constant 0 : index
      %c0_25 = arith.constant 0 : index
      %37 = vector.load %arg4[%c0_23, %c0_24, %c0_25] : memref<1x8x32xf32, #tpu.memory_space<vmem>>, vector<1x8x32xf32>
      %38 = vector.shape_cast %37 : vector<1x8x32xf32> to vector<8x32xf32>
      %cst_26 = arith.constant 0.000000e+00 : f32
      %39 = vector.broadcast %cst_26 : f32 to vector<8x32xf32>
      %40 = arith.select %36, %38, %39 : vector<8x32xi1>, vector<8x32xf32>
      %41 = arith.mulf %40, %31 : vector<8x32xf32>
      %cst_27 = arith.constant dense<0.000000e+00> : vector<8xf32>
      %42 = vector.multi_reduction <add>, %41, %cst_27 [1] : vector<8x32xf32> to vector<8xf32>
      %43 = vector.shape_cast %42 : vector<8xf32> to vector<8x1xf32>
      %cst_28 = arith.constant dense<0.000000e+00> : vector<1xf32>
      %44 = vector.multi_reduction <add>, %43, %cst_28 [0] : vector<8x1xf32> to vector<1xf32>
      %45 = vector.shape_cast %44 : vector<1xf32> to vector<1x1xf32>
      %cst_29 = arith.constant 0.000000e+00 : f32
      %46 = vector.broadcast %cst_29 : f32 to vector<1x1xf32>
      %47 = arith.subf %46, %45 : vector<1x1xf32>
      %c0_30 = arith.constant 0 : index
      %c0_31 = arith.constant 0 : index
      %c0_32 = arith.constant 0 : index
      %48 = vector.load %arg8[%c0_30, %c0_31, %c0_32] : memref<1x1x1xf32, #tpu.memory_space<vmem>>, vector<1x1x1xf32>
      %49 = vector.shape_cast %48 : vector<1x1x1xf32> to vector<1x1xf32>
      %50 = vector.shape_cast %47 : vector<1x1xf32> to vector<1x1x1xf32>
      tpu.vector_store %arg8[%c0_30, %c0_31, %c0_32], %50 {strides = array<i32>} : memref<1x1x1xf32, #tpu.memory_space<vmem>>, vector<1x1x1xf32>,
      %cst_33 = arith.constant -3.40282347E+38 : f32
      %51 = vector.broadcast %cst_33 : f32 to vector<8x32xf32>
      %52 = arith.select %36, %31, %51 : vector<8x32xi1>, vector<8x32xf32>
      %c0_34 = arith.constant 0 : index
      %c0_35 = arith.constant 0 : index
      %c0_36 = arith.constant 0 : index
      %53 = vector.load %arg6[%c0_34, %c0_35, %c0_36] : memref<1x8x32xf32, #tpu.memory_space<vmem>>, vector<1x8x32xf32>
      %54 = vector.shape_cast %53 : vector<1x8x32xf32> to vector<8x32xf32>
      %55 = vector.shape_cast %52 : vector<8x32xf32> to vector<1x8x32xf32>
      tpu.vector_store %arg6[%c0_34, %c0_35, %c0_36], %55 {strides = array<i32>} : memref<1x8x32xf32, #tpu.memory_space<vmem>>, vector<1x8x32xf32>,
      %cst_37 = arith.constant -3.40282347E+38 : f32
      %56 = vector.broadcast %cst_37 : f32 to vector<8x32xf32>
      %57 = arith.select %36, %3, %56 : vector<8x32xi1>, vector<8x32xf32>
      %cst_38 = arith.constant dense<0xFF800000> : vector<8xf32>
      %58 = vector.multi_reduction <maximumf>, %57, %cst_38 [1] : vector<8x32xf32> to vector<8xf32>
      %59 = vector.shape_cast %58 : vector<8xf32> to vector<8x1xf32>
      %60 = vector.broadcast %59 : vector<8x1xf32> to vector<8x32xf32>
      %61 = arith.subf %57, %60 : vector<8x32xf32>
      %62 = math.exp %61 : vector<8x32xf32>
      %cst_39 = arith.constant dense<0.000000e+00> : vector<8xf32>
      %63 = vector.multi_reduction <add>, %62, %cst_39 [1] : vector<8x32xf32> to vector<8xf32>
      %64 = vector.shape_cast %63 : vector<8xf32> to vector<8x1xf32>
      %65 = vector.broadcast %64 : vector<8x1xf32> to vector<8x32xf32>
      %66 = arith.divf %62, %65 : vector<8x32xf32>
      %cst_40 = arith.constant 0.000000e+00 : f32
      %67 = vector.broadcast %cst_40 : f32 to vector<8x32xf32>
      %68 = arith.select %36, %66, %67 : vector<8x32xi1>, vector<8x32xf32>
      %c0_41 = arith.constant 0 : index
      %c0_42 = arith.constant 0 : index
      %c0_43 = arith.constant 0 : index
      %69 = vector.load %arg7[%c0_41, %c0_42, %c0_43] : memref<1x8x32xf32, #tpu.memory_space<vmem>>, vector<1x8x32xf32>
      %70 = vector.shape_cast %69 : vector<1x8x32xf32> to vector<8x32xf32>
      %71 = vector.shape_cast %68 : vector<8x32xf32> to vector<1x8x32xf32>
      tpu.vector_store %arg7[%c0_41, %c0_42, %c0_43], %71 {strides = array<i32>} : memref<1x8x32xf32, #tpu.memory_space<vmem>>, vector<1x8x32xf32>,
    } else {
    }
    return
  }
  func.func @transform_0(%arg0: i32, %arg1: i32, %arg2: memref<4xi32, #tpu.memory_space<smem>>) -> (i32, i32, i32, i32) {
    %c1_i32 = arith.constant 1 : i32
    %0 = arith.addi %arg1, %c1_i32 : i32
    %c3_i32 = arith.constant 3 : i32
    %c0_i32 = arith.constant 0 : i32
    %1 = arith.cmpi eq, %c3_i32, %c0_i32 : i32
    %c1_i32_0 = arith.constant 1 : i32
    %2 = arith.select %1, %c1_i32_0, %c3_i32 : i32
    %3 = arith.remsi %0, %2 : i32
    %c0_i32_1 = arith.constant 0 : i32
    %4 = arith.cmpi ne, %3, %c0_i32_1 : i32
    %c0_i32_2 = arith.constant 0 : i32
    %5 = arith.cmpi slt, %3, %c0_i32_2 : i32
    %c0_i32_3 = arith.constant 0 : i32
    %6 = arith.cmpi slt, %2, %c0_i32_3 : i32
    %7 = arith.xori %5, %6 : i1
    %8 = arith.andi %7, %4 : i1
    %9 = arith.addi %3, %2 : i32
    %10 = arith.select %8, %9, %3 : i32
    %11 = arith.addi %arg0, %10 : i32
    %c4_i32 = arith.constant 4 : i32
    %c0_i32_4 = arith.constant 0 : i32
    %12 = arith.cmpi eq, %c4_i32, %c0_i32_4 : i32
    %c1_i32_5 = arith.constant 1 : i32
    %13 = arith.select %12, %c1_i32_5, %c4_i32 : i32
    %14 = arith.remsi %11, %13 : i32
    %c0_i32_6 = arith.constant 0 : i32
    %15 = arith.cmpi ne, %14, %c0_i32_6 : i32
    %c0_i32_7 = arith.constant 0 : i32
    %16 = arith.cmpi slt, %14, %c0_i32_7 : i32
    %c0_i32_8 = arith.constant 0 : i32
    %17 = arith.cmpi slt, %13, %c0_i32_8 : i32
    %18 = arith.xori %16, %17 : i1
    %19 = arith.andi %18, %15 : i1
    %20 = arith.addi %14, %13 : i32
    %21 = arith.select %19, %20, %14 : i32
    %c0_i32_9 = arith.constant 0 : i32
    %c0_i32_10 = arith.constant 0 : i32
    %c0_i32_11 = arith.constant 0 : i32
    return %arg0, %21, %c0_i32_9, %c0_i32_10 : i32, i32, i32, i32
  }
  func.func @transform_1(%arg0: i32, %arg1: i32, %arg2: memref<4xi32, #tpu.memory_space<smem>>) -> (i32, i32, i32) {
    %0 = arith.index_cast %arg0 : i32 to index
    %1 = memref.load %arg2[%0] : memref<4xi32, #tpu.memory_space<smem>>
    %c0_i32 = arith.constant 0 : i32
    %c0_i32_0 = arith.constant 0 : i32
    %c0_i32_1 = arith.constant 0 : i32
    return %1, %c0_i32, %c0_i32_0 : i32, i32, i32
  }
  func.func @transform_2(%arg0: i32, %arg1: i32, %arg2: memref<4xi32, #tpu.memory_space<smem>>) -> (i32, i32, i32) {
    %c0_i32 = arith.constant 0 : i32
    %c0_i32_0 = arith.constant 0 : i32
    %c0_i32_1 = arith.constant 0 : i32
    return %arg0, %c0_i32, %c0_i32_0 : i32, i32, i32
  }
  func.func @transform_3(%arg0: i32, %arg1: i32, %arg2: memref<4xi32, #tpu.memory_space<smem>>) -> (i32, i32, i32) {
    %c0_i32 = arith.constant 0 : i32
    %c0_i32_0 = arith.constant 0 : i32
    %c0_i32_1 = arith.constant 0 : i32
    return %arg0, %c0_i32, %c0_i32_0 : i32, i32, i32
  }
  func.func @transform_4(%arg0: i32, %arg1: i32, %arg2: memref<4xi32, #tpu.memory_space<smem>>) -> (i32, i32, i32) {
    %c0_i32 = arith.constant 0 : i32
    %c0_i32_0 = arith.constant 0 : i32
    %c0_i32_1 = arith.constant 0 : i32
    return %arg0, %c0_i32, %c0_i32_0 : i32, i32, i32
  }
  func.func @transform_5(%arg0: i32, %arg1: i32, %arg2: memref<4xi32, #tpu.memory_space<smem>>) -> (i32, i32, i32) {
    %c0_i32 = arith.constant 0 : i32
    %c0_i32_0 = arith.constant 0 : i32
    %c0_i32_1 = arith.constant 0 : i32
    return %arg0, %c0_i32, %c0_i32_0 : i32, i32, i32
  }
}

</mosaic_0001>

<bundles_post_ra>
// kernel: tpu_custom_call.1
= control target key start
LH: loop header
LB: loop body
LE: loop exit
PB: predicated region body
PF: predicated region fallthrough
CT: control target
= control target key end

     0   :  { %s1706_s0 = inlined_call_operand.hbm [shape: s32[4], index: 0, kind: input, shape index: {}]   ;;  %s1707_s1 = inlined_call_operand.hbm [shape: f32[4,4,8,32], index: 1, kind: input, shape index: {}]   ;;  %s1708_s2 = inlined_call_operand.hbm [shape: f32[8,8,32], index: 2, kind: input, shape index: {}]   ;;  %s1709_s3 = inlined_call_operand.vmem [shape: s8[4,8,32], index: 3, kind: input, shape index: {}]   ;;  %s1710_s4 = inlined_call_operand.hbm [shape: f32[4,8,32], index: 4, kind: output, shape index: {0}]   ;;  %s1711_s5 = inlined_call_operand.hbm [shape: f32[4,8,32], index: 5, kind: output, shape index: {1}]   ;;  %s1712_s6 = inlined_call_operand.vmem [shape: f32[4,1,1], index: 6, kind: output, shape index: {2}]  }
   0x1   :  { %1725 = sst [smem:[#allocation29_spill]] %s1707_s1  ;;  %s941_s23 = scalar_lea.hbm %s1706_s0, 16 }
   0x2   :  { %1726 = sst [smem:[#allocation30_spill]] %s1709_s3  ;;  %p942_p0 = scmp.ne.s32.totalorder %s1706_s0, %s941_s23 }
   0x3   :  { %1727 = sst [smem:[#allocation31_spill]] %s1710_s4  ;;  %p945_p1 = scmp.lt.u32.totalorder %s941_s23, %s1706_s0 }
   0x4   :  { %1728 = sst [smem:[#allocation32_spill]] %s1711_s5 }
   0x5   :  { %p947_p2 = pnand %p945_p1, %p942_p0 }
   0x7   :  { %950 = shalt.err (!%p947_p2)  }
   0x8   :  { %s1197_s28 = smov [#allocation5]  }
   0x9   :  { %13 = dma.hbm_to_smem %s1706_s0, 16, %s1197_s28, [#allocation4] }
   0xa   :  { %1123 = dma.done.wait [#allocation4], 16 }
   0xb   :  { %1124 = vsyncadd [#allocation4], 4294967280 }
   0xc   :  { %15 = sfence }
   0xd   :  { %16 = vsyncpa [#allocation7], 0 }
   0xe   :  { %18 = vsyncpa [#allocation7 + $0x1], 0 }
   0xf   :  { %19 = vsyncpa [#allocation10], 0 }
  0x10   :  { %21 = vsyncpa [#allocation10 + $0x1], 0 }
  0x11   :  { %22 = vsyncpa [#allocation8], 0 }
  0x12   :  { %24 = vsyncpa [#allocation8 + $0x1], 0 }
  0x13   :  { %25 = vsyncpa [#allocation13], 0 }
  0x14   :  { %27 = vsyncpa [#allocation13 + $0x1], 0  ;;  %s1253_s7 = smov 0   ;;  %s1255_s8 = smov 0  }
  0x15   :  { %s1257_s9 = smov 0   ;;  %s1259_s10 = smov 0  }
  0x16   :  { %s1261_s0 = smov 0   ;;  %s1263_s11 = smov 0  }
  0x17   :  { %s1265_s12 = smov 0   ;;  %s1267_s13 = smov 0  }
  0x18   :  { %s1269_s14 = smov 0   ;;  %s1271_s15 = smov 0  }
  0x19   :  { %s1273_s16 = smov 0   ;;  %s1275_s17 = smov 0  }
  0x1a   :  { %s1277_s18 = smov 0   ;;  %s1279_s19 = smov 0  }
  0x1b LB: > { %1729 = sst [smem:[#allocation21_spill]] %s1151_s9  ;;  %s1713_s20 = sadd.s32 4294967295, %s1195_s19   ;;  %s1195_s19 = sphi %s1279_s19, %s33_s19   ;;  %s1191_s18 = sphi %s1277_s18, %s1783_s18   ;;  %s1187_s17 = sphi %s1275_s17, %s1772_s17   ;;  %s1183_s16 = sphi %s1273_s16, %s1782_s16   ;;  %s1179_s15 = sphi %s1271_s15, %s1771_s15   ;;  %s1175_s14 = sphi %s1269_s14, %s1781_s14   ;;  %s1171_s13 = sphi %s1267_s13, %s1780_s13   ;;  %s1167_s12 = sphi %s1265_s12, %s1779_s12   ;;  %s1163_s11 = sphi %s1263_s11, %s1778_s11   ;;  %s1159_s0 = sphi %s1261_s0, %s1777_s0   ;;  %s1155_s10 = sphi %s1259_s10, %s1776_s10   ;;  %s1151_s9 = sphi %s1257_s9, %s1769_s9   ;;  %s1147_s8 = sphi %s1255_s8, %s1775_s8   ;;  %s1143_s7 = sphi %s1253_s7, %s1774_s7  }
  0x1c   : > { %1730 = sst [smem:[#allocation22_spill]] %s1179_s15  ;;  %s42_s22 = sadd.s32 1, %s1187_s17 }
  0x1d   : > { %1731 = sst [smem:[#allocation23_spill]] %s1187_s17  ;;  %p43_p3 = scmp.ge.s32.totalorder %s42_s22, 3 }
  0x1e   : > { %s45_s23 = sadd.s32 1, %s1191_s18  ;;  %s51_s24 = ssub.s32 0, %s42_s22 }
  0x1f   : > { %s1327_s25 = scalar_select %p43_p3, 0, %s42_s22  }
  0x20   : > { %s1785_s23 = smov (!%p43_p3, %s45_s23), %s1191_s18  ;;  %s740_s26 = smin.u32 %s51_s24, %s42_s22 }
  0x21   : > { %1732 = sst [smem:[#allocation24_spill]] %s1327_s25  ;;  %s76_s27 = sadd.s32 1, %s1327_s25 }
  0x22   : > { %p47_p4 = scmp.ge.s32.totalorder %s1785_s23, 4  ;;  %925 = sdivrem.u32 %s740_s26, 3 }
  0x23   : > { %s78_s28 = ssub.s32 0, %s76_s27  ;;  %p115_p5 = scmp.ne.s32.totalorder %s1175_s14, %s1171_s13 }
  0x24   : > { %s1787_s23 = smov (%p47_p4, %s1785_s23), 0  ;;  %s746_s29 = smin.u32 %s78_s28, %s76_s27 }
  0x25   : > { %1733 = sst [smem:[#allocation25_spill]] %s1787_s23  ;;  %927 = sdivrem.u32 %s746_s29, 3 }
  0x26   : > { %s1336_s21 = ssub.s32 %s1191_s18, %s1787_s23  ;;  %p121_p6 = scmp.ne.s32.totalorder %s1171_s13, %s1167_s12 }
  0x27   : > { %p1344_p7 = scmp.eq.s32.totalorder %s1713_s20, 0  ;;  %p116_p8 = scmp.eq.s32.totalorder %s1195_s19, 0 }
  0x28   : > { %s131_s24 = sld [smem:[#allocation5 + %s1191_s18]]  ;;  %s136_s29 = sadd.s32 1, %s1163_s11 }
  0x29   : > { %p1352_p9 = por %p1344_p7, %p121_p6  ;;  %s132_s27 = sld [smem:[#allocation5 + %s1787_s23]] }
  0x2a   : > { %p1359_p10 = por %p116_p8, %p115_p5  ;;  %p143_p11 = scmp.ne.s32.totalorder %s1163_s11, %s1159_s0 }
  0x2b   : > { %s1735_s26 = scalar_select %p1352_p9, 1, 0 }
  0x2c   : > { %s926_s28 = spop.drf %925  ;;  %p149_p12 = scmp.ne.s32.totalorder %s1159_s0, %s1155_s10 }
  0x2d   : > { %p742_p13 = scmp.lt.s32.totalorder %s926_s28, 0  ;;  %s61_s30 = sadd.s32 3, %s926_s28 }
  0x2e   : > { %s928_s20 = spop.drf %927  ;;  %p1375_p1 = por %p149_p12, %p1344_p7 }
  0x2f   : > { %s133_s25 = ssub.s32 %s131_s24, %s132_s27  ;;  %s1789_s30 = smov (!%p742_p13, %s61_s30), %s926_s28 }
  0x30   : > { %p1368_p0 = scmp.eq.s32.totalorder %s133_s25, 0  ;;  %s63_s5 = sadd.s32 %s1191_s18, %s1789_s30 }
  0x31   : > { %s1738_s4 = scalar_select %p1375_p1, 1, 0 }
  0x32   : > { %p64_p2 = scmp.lt.s32.totalorder %s63_s5, 0  ;;  %s65_s10 = ssub.s32 0, %s63_s5 }
  0x33   : > { %s743_s15 = smin.u32 %s65_s10, %s63_s5  ;;  %p186_p3 = scmp.eq.s32.totalorder %s1336_s21, 0 }
  0x34   : > { %s67_s24 = sand.u32 3, %s743_s15   ;;  %s188_s27 = sadd.s32 1, %s1151_s9 }
  0x35   : > { %s68_s25 = ssub.s32 0, %s67_s24  ;;  %p198_p4 = scmp.ne.s32.totalorder %s1151_s9, %s1147_s8 }
  0x36   : > { %s1791_s25 = smov (!%p64_p2, %s68_s25), %s67_s24  ;;  %p748_p6 = scmp.lt.s32.totalorder %s928_s20, 0 }
  0x37   : > { %p745_p5 = scmp.lt.s32.totalorder %s1791_s25, 0  ;;  %s74_s30 = sadd.s32 4, %s1791_s25 }
  0x38   : > { %s88_s22 = sadd.s32 3, %s928_s20  ;;  %s1740_s28 = sadd.s32 4294967295, %s1195_s19  }
  0x39   : > { %s1793_s30 = smov (!%p745_p5, %s74_s30), %s1791_s25  ;;  %s1795_s22 = smov (!%p748_p6, %s88_s22), %s928_s20 }
  0x3a   : > { %s1388_s5 = scalar_select %p1368_p0, %s1163_s11, %s136_s29  }
  0x3b   : > { %s90_s15 = sadd.s32 %s1795_s22, %s1787_s23  ;;  %p199_p7 = scmp.eq.s32.totalorder %s1740_s28, 11 }
  0x3c   : > { %1739 = sst [smem:[#allocation26_spill]] %s1388_s5  ;;  %p91_p12 = scmp.lt.s32.totalorder %s90_s15, 0 }
  0x3d   : > { %s92_s10 = ssub.s32 0, %s90_s15  ;;  %p1396_p13 = por %p199_p7, %p198_p4 }
  0x3e   : > { %s749_s24 = smin.u32 %s92_s10, %s90_s15  ;;  %p204_p2 = scmp.ne.s32.totalorder %s1147_s8, %s1143_s7 }
  0x3f   : > { %s1741_s3 = scalar_select %p1396_p13, 1, 0 }
  0x40   : > { %s94_s25 = sand.u32 3, %s749_s24   ;;  %s1742_s20 = sadd.s32 4294967294, %s1195_s19  }
  0x41   : > { %s95_s17 = ssub.s32 0, %s94_s25  ;;  %p205_p0 = scmp.eq.s32.totalorder %s1742_s20, 11 }
  0x42   : > { %s1797_s17 = smov (!%p91_p12, %s95_s17), %s94_s25  ;;  %p1721_p6 = scmp.lt.s32.totalorder %s1195_s19, 12 }
  0x43   : > { %s1407_s29 = scalar_select %p186_p3, %s1151_s9, %s188_s27  }
  0x44   : > { %p751_p5 = scmp.lt.s32.totalorder %s1797_s17, 0  ;;  %s101_s22 = sadd.s32 4, %s1797_s17 }
  0x45   : > { %1743 = sst [smem:[#allocation27_spill]] %s1407_s29  ;;  %p1409_p4 = por %p205_p0, %p204_p2 }
  0x46   : > { %s1799_s22 = smov (!%p751_p5, %s101_s22), %s1797_s17  ;;  %s277_s28 = sand.u32 1, %s1175_s14  }
  0x47   : > { %s1744_s15 = scalar_select %p1409_p4, 1, 0 }
  0x48   : > { %s104_s10 = ssub.s32 %s1793_s30, %s1799_s22  ;;  %s754_s25 = sshll.u32 %s277_s28, 3 }
  0x49   : > { %1745 = sst [smem:[#allocation28_spill]] %s1744_s15  ;;  %s105_s24 = sor.u32 %s104_s10, %s1336_s21 }
  0x4a   : > { %p106_p3 = scmp.eq.s32.totalorder %s105_s24, 0  ;;  %s761_s27 = sshll.u32 %s1191_s18, 2 }
  0x4b   : > { %s281_s20 = scalar_lea.vmem [#allocation6], %s754_s25  ;;  %s1746_s5 = sadd.s32 1, %s1175_s14 }
  0x4c   : > { %s317_s23 = sshll.u32 %s281_s20, 4  ;;  %s313_s9 = sadd.s32 %s761_s27, %s1793_s30  ;;  %s1424_s23 = int_to_ptr.vmem [resolvable:$true] %s317_s23 }
  0x4d   : > { %s1421_s29 = scalar_select %p106_p3, %s1175_s14, %s1746_s5  }
  0x4e   : > { %s762_s17 = sshll.u32 %s313_s9, 7  ;;  %p1430_p7 = pnand %p1721_p6, %p1359_p10 }
  0x4f   : > { %s1748_s1 = sld [smem:[#allocation29_spill]]  ;;  %s324_s30 = sand.u32 1, %s1163_s11  }
  0x50   : > { %p1445_p12 = por %p143_p11, %p116_p8  ;;  %s278_s12 = scalar_lea.sflag [#allocation7], %s277_s28 }
  0x51   : > { %p953_p2 = pneg %p1430_p7 }
  0x55   : > { %s1437_s10 = scalar_lea.hbm %s1748_s1, %s762_s17  ;;  %s956_s27 = scalar_lea.hbm %s1748_s1, 2048 }
  0x56   : > { %s951_s5 = scalar_lea.hbm %s1437_s10, 128  ;;  %p957_p8 = scmp.lt.u32.totalorder %s1437_s10, %s1748_s1 }
  0x57   : > { %p952_p10 = scmp.ne.s32.totalorder %s1437_s10, %s951_s5  ;;  %p958_p11 = scmp.lt.u32.totalorder %s956_s27, %s951_s5 }
  0x58   : > { %p960_p6 = scmp.lt.u32.totalorder %s951_s5, %s1437_s10 }
  0x59   : > { %p954_p0 = pnand %p953_p2, %p952_p10  ;;  %p959_p3 = por %p958_p11, %p957_p8 }
  0x5b   : > { %p955_p5 = pneg %p954_p0  ;;  %p961_p4 = por %p960_p6, %p959_p3 }
  0x5d   : > { %p962_p13 = pnand %p961_p4, %p955_p5 }
  0x5f   : > { %965 = shalt.err (!%p962_p13)
}
  0x60   : > { %s966_s28 = scalar_lea.vmem %s1424_s23, 128  ;;  %s1198_s22 = smov [#allocation6]  }
  0x61   : > { %p967_p10 = scmp.ne.s32.totalorder %s1424_s23, %s966_s28  ;;  %s971_s21 = sshll.u32 %s1198_s22, 4  ;;  %s972_s21 = int_to_ptr.vmem [resolvable:$false] %s971_s21 }
  0x62   : > { %s973_s24 = scalar_lea.vmem %s972_s21, 256  ;;  %p974_p9 = scmp.lt.s32.totalorder %s1424_s23, %s972_s21 }
  0x63   : > { %p969_p0 = pnand %p967_p10, %p953_p2  ;;  %p975_p8 = scmp.lt.s32.totalorder %s973_s24, %s966_s28 }
  0x65   : > { %p970_p1 = pneg %p969_p0  ;;  %p976_p11 = por %p975_p8, %p974_p9 }
  0x67   : > { %p977_p6 = pnand %p976_p11, %p970_p1 }
  0x69   : > { %980 = shalt.err (!%p977_p6)
}
  0x6a   : > { %792 = dma.hbm_to_vmem [thread:$0]  (!%p1430_p7), %s1437_s10, 128, %s1424_s23, %s278_s12  }
  0x6b   : > { %s763_s5 = sshll.u32 %s324_s30, 3  ;;  %p1750_p9 = scmp.lt.s32.totalorder %s1195_s19, 12 }
  0x6c   : > { %s780_s25 = scalar_select %p1445_p12, [#allocation5], [#allocation14] }
  0x6d   : > { %p1480_p1 = pnand %p1750_p9, %p1445_p12  ;;  %p1752_p13 = pmov %p1750_p9 }
  0x6e   : > { %s781_s27 = scalar_select %p1445_p12, %s1191_s18, 0 }
  0x6f   : > { %s1801_s25 = smov (!%p1752_p13, %s780_s25), [#allocation15]  ;;  %p1753_p4 = pmov %p1750_p9 }
  0x70   : > { %p765_p7 = scmp.ge.s32.totalorder %s1195_s19, 1  ;;  %p348_p2 = scmp.lt.s32.totalorder %s1195_s19, 13 }
  0x71   : > { %s1803_s27 = smov (!%p1753_p4, %s781_s27), 0  ;;  %s328_s10 = scalar_lea.vmem [#allocation9], %s763_s5 }
  0x72   : > { %s329_s23 = sld [smem:[%s1801_s25 + %s1803_s27]]  ;;  %s336_s12 = sshll.u32 %s328_s10, 4  ;;  %s1499_s12 = int_to_ptr.vmem [resolvable:$true] %s336_s12 }
  0x73   : > { %p1495_p5 = pnand %p765_p7, %p348_p2  ;;  %s325_s21 = scalar_lea.sflag [#allocation10], %s324_s30 }
  0x74   : > { %p983_p3 = pneg %p1480_p1  ;;  %s986_s27 = scalar_lea.hbm %s1708_s2, 1024 }
  0x78   : > { %s764_s17 = sshll.u32 %s329_s23, 7 }
  0x79   : > { %s1504_s22 = scalar_lea.hbm %s1708_s2, %s764_s17 }
  0x7a   : > { %s981_s24 = scalar_lea.hbm %s1504_s22, 128  ;;  %p987_p8 = scmp.lt.u32.totalorder %s1504_s22, %s1708_s2 }
  0x7b   : > { %p982_p12 = scmp.ne.s32.totalorder %s1504_s22, %s981_s24  ;;  %p988_p11 = scmp.lt.u32.totalorder %s986_s27, %s981_s24 }
  0x7c   : > { %p990_p9 = scmp.lt.u32.totalorder %s981_s24, %s1504_s22 }
  0x7d   : > { %p984_p10 = pnand %p983_p3, %p982_p12  ;;  %p989_p6 = por %p988_p11, %p987_p8 }
  0x7f   : > { %p985_p0 = pneg %p984_p10  ;;  %p991_p13 = por %p990_p9, %p989_p6 }
  0x81   : > { %p992_p4 = pnand %p991_p13, %p985_p0 }
  0x83   : > { %995 = shalt.err (!%p992_p4)
}
  0x84   : > { %s996_s30 = scalar_lea.vmem %s1499_s12, 128  ;;  %s1199_s17 = smov [#allocation9]  }
  0x85   : > { %p997_p7 = scmp.ne.s32.totalorder %s1499_s12, %s996_s30  ;;  %s1001_s9 = sshll.u32 %s1199_s17, 4  ;;  %s1002_s9 = int_to_ptr.vmem [resolvable:$false] %s1001_s9 }
  0x86   : > { %s1003_s28 = scalar_lea.vmem %s1002_s9, 256  ;;  %p1004_p10 = scmp.lt.s32.totalorder %s1499_s12, %s1002_s9 }
  0x87   : > { %p999_p2 = pnand %p997_p7, %p983_p3  ;;  %p1005_p8 = scmp.lt.s32.totalorder %s1003_s28, %s996_s30 }
  0x89   : > { %p1000_p12 = pneg %p999_p2  ;;  %p1006_p11 = por %p1005_p8, %p1004_p10 }
  0x8b   : > { %p1007_p6 = pnand %p1006_p11, %p1000_p12 }
  0x8d   : > { %1010 = shalt.err (!%p1007_p6)
}
  0x8e   : > { %797 = dma.hbm_to_vmem [thread:$0]  (!%p1480_p1), %s1504_s22, 128, %s1499_s12, %s325_s21  }
  0x8f   : > { %352 = sbr.rel (%p1495_p5) target bundleno = 977 (0x3d1), region = 32  ;;  %s354_s24 = sand.u32 (!%p1495_p5), 1, %s1171_s13  }
  0x90   : > { %s766_s5 = sshll.u32 (!%p1495_p5), %s354_s24, 3  ;;  %s355_s25 = scalar_lea.sflag (!%p1495_p5), [#allocation7], %s354_s24 }
  0x91   : > { %s358_s27 = scalar_lea.vmem (!%p1495_p5), [#allocation6], %s766_s5  ;;  %p1755_p3 = scmp.ne.s32.totalorder (!%p1495_p5), %s1735_s26, 0 }
  0x96   : > { %1126 = dma.done.wait (%p1755_p3), %s355_s25, 128  }
  0x97   : > { %1128 = vsyncadd (%p1755_p3), %s355_s25, 4294967168  ;;  %s363_s15 = sand.u32 1, %s1159_s0   ;;  %p1756_p1 = scmp.ne.s32.totalorder %s1738_s4, 0 }
  0x98   : > { %s1541_s23 = sshll.u32 %s363_s15, 3  ;;  %s364_s12 = scalar_lea.sflag [#allocation10], %s363_s15 }
  0x99   : > { %s367_s20 = scalar_lea.vmem [#allocation9], %s1541_s23 }
  0x9a   : > { %1130 = dma.done.wait (%p1756_p1), %s364_s12, 128  }
  0x9b   : > { %1132 = vsyncadd (%p1756_p1), %s364_s12, 4294967168  ;;  %s1549_s22 = sand.u32 1, %s1147_s8   ;;  %p439_p5 = scmp.lt.s32.totalorder %s1183_s16, 3  ;;  %v446_v0 = vld [vmem:[%s358_s27] sm:$0xff] }
  0x9c   : > { %s768_s26 = sshll.u32 %s1549_s22, 3  ;;  %s1757_s24 = sld [smem:[#allocation30_spill]]  ;;  %v1566_v1 = vmul.f32 14.285714, %v446_v0 }
  0x9d   : > { %s1554_s21 = scalar_select %p439_p5, %s1183_s16, 3 }
  0x9e   : > { %s1568_s25 = scalar_lea.vmem [#allocation11], %s768_s26  ;;  %s1570_s15 = scalar_lea.vmem [#allocation12], %s768_s26 }
  0x9f   : > { %s770_s10 = sshll.u32 %s1554_s21, 1  ;;  %s445_s9 = scalar_lea.vmem %s1712_s6, %s1554_s21 }
  0xa0   : > { %s1758_s12 = sld [smem:[#allocation22_spill]] }
  0xa2   : > { %s1564_s5 = scalar_lea.vmem %s1757_s24, %s770_s10 }
  0xa6   : > { %p771_p0 = scmp.ne.s32.totalorder %s1758_s12, 0 }
  0xa7   : > { %vm452_vm0 = vcmask (!%p771_p0), 7168   ;;  %v1200_v2 = vmov (!%p771_p0), -inf   ;;  %v1201_v3 = vmov (!%p771_p0), 0.0  }
  0xa8   : > { %451 = sbr.rel (%p771_p0) target bundleno = 175 (0xaf), region = 44  ;;  %453 = vst.msk [vmem:[#allocation2] sm:$0xff] (!%p771_p0), %vm452_vm0, %v1200_v2  ;;  %454 = vst.msk [vmem:[#allocation3] sm:$0xff] (!%p771_p0), %vm452_vm0, %v1201_v3 }
  0xaf PF: > { %vm456_vm1 = vcmask 261120   ;;  %v1202_v5 = vmov 0   ;;  %v455_v6 = vld [vmem:[#allocation2] sm:$0xff]  ;;  %vm478_vm2 = vcmask 7168   ;;  %v464_v17 = vld [vmem:[#allocation3] sm:$0xff]  ;;  %s1759_s27 = sld [smem:[#allocation22_spill]] }
  0xb0   : > { %v457_v4 = vsel %vm456_vm1, %v1566_v1, -inf  ;;  %929 = vset.pattern.permute.xlu0 %v1202_v5 }
  0xb1   : > { %458 = vmax.xlane.f32.xlu0 %v457_v4 }
  0xb5   : > { %p772_p9 = scmp.ne.s32.totalorder %s1759_s27, 2 }
  0xb6   : > { %v496_v21 = vld [vmem:[%s1564_s5] sm:$0x3] (!%p772_p9)  ;;  %v1203_v23 = vmov (!%p772_p9), 0   ;;  %v500_v35 = vld [vmem:[%s367_s20] sm:$0xff] (!%p772_p9)  ;;  %vm513_vm4 = vcmask (!%p772_p9), 0  }
  0xb7   : > { %v497_v22 = vunpack.c.0.s8 (!%p772_p9), %v496_v21 }
  0xb9   : > { %v498_v24 = vcvt.s32.f32 (!%p772_p9), %v497_v22 }
  0xbb   : > { %vm499_vm3 = vcmp.gt.f32.partialorder (!%p772_p9), %v498_v24, 0.0 }
  0xbc   : > { %v517_v25 = vsel (!%p772_p9), %vm499_vm3, %v1566_v1, -3.4028235e+38  ;;  %v501_v37 = vsel (!%p772_p9), %vm499_vm3, %v500_v35, 0.0 }
  0xbd   : > { %v518_v27 = vsel (!%p772_p9), %vm456_vm1, %v517_v25, -inf }
 0x13e   : > { %v459_v7 = vpop.xlane.xlu0 %458 }
 0x13f   : > { %v460_v8 = vmax.f32 %v455_v6, %v459_v7 }
 0x141   : > { %v461_v9 = vsub.f32 %v455_v6, %v460_v8  ;;  %480 = vst.msk [vmem:[#allocation2] sm:$0xff] %vm478_vm2, %v460_v8  ;;  %468 = vperm.xlu0 %929, %v460_v8  }
 0x143   : > { %v462_v15 = vmul.f32 1.442695, %v461_v9 }
 0x145   : > { %934 = vset.pattern.permute.xlu0 (!%p772_p9), %v1203_v23 }
 0x148   : > { %v485_v30 = vld [vmem:[#allocation2] sm:$0xff] (!%p772_p9) }
 0x160   : > { %519 = vmax.xlane.f32.xlu0 (!%p772_p9), %v518_v27 }
 0x1c0   : > { %v469_v10 = vpop.permute.xlu0 %468 }
 0x1c1   : > { %v471_v11 = vsub.f32 %v1566_v1, %v469_v10 }
 0x1c3   : > { %v472_v12 = vmul.f32 1.442695, %v471_v11 }
 0x1c5   : > { %930 = vpow2.f32 %v472_v12 }
 0x1c6   : > { %932 = vpow2.f32 %v462_v15 }
 0x1cf   : > { %v931_v13 = vpop.eup %930 }
 0x1d0   : > { %v474_v14 = vsel %vm456_vm1, %v931_v13, 0.0  ;;  %v933_v16 = vpop.eup %932 }
 0x1d1   : > { %475 = vadd.xlane.f32.xlu1 %v474_v14  ;;  %v465_v18 = vmul.f32 %v933_v16, %v464_v17 }
 0x1ed   : > { %v520_v32 = vpop.xlane.xlu0 (!%p772_p9), %519 }
 0x1ee   : > { %v521_v33 = vsub.f32 (!%p772_p9), %v517_v25, %v520_v32 }
 0x1f0   : > { %v522_v34 = vmul.f32 (!%p772_p9), 1.442695, %v521_v33 }
 0x25b   : > { %484 = sbr.rel (%p772_p9) target bundleno = 926 (0x39e), region = 48 }
 0x25e   : > { %v476_v19 = vpop.xlane.xlu1 %475 }
 0x25f   : > { %v477_v20 = vadd.f32 %v476_v19, %v465_v18 }
 0x261   : > { %479 = vst.msk [vmem:[#allocation3] sm:$0xff] %vm478_vm2, %v477_v20 }
 0x268   : > { %v486_v26 = vld [vmem:[#allocation3] sm:$0xff] }
 0x269   : > { %935 = vlog2.f32 %v486_v26 }
 0x26a   : > { %937 = vpow2.f32 %v522_v34 }
 0x273   : > { %v936_v28 = vpop.eup %935 }
 0x274   : > { %v488_v29 = vmul.f32 0.6931472, %v936_v28  ;;  %v938_v42 = vpop.eup %937 }
 0x275   : > { %v524_v43 = vsel %vm456_vm1, %v938_v42, 0.0 }
 0x276   : > { %v489_v31 = vadd.f32 %v488_v29, %v485_v30 }
 0x278   : > { %492 = vperm.xlu0 %934, %v489_v31  }
 0x2f7   : > { %v493_v36 = vpop.permute.xlu0 %492 }
 0x2f8   : > { %v495_v38 = vsub.f32 %v1566_v1, %v493_v36 }
 0x2fa   : > { %v515_v39 = vsel %vm499_vm3, %v495_v38, -3.4028235e+38  ;;  %v502_v40 = vmul.f32 %v501_v37, %v495_v38 }
 0x2fb   : > { %516 = vst.msk [vmem:[%s1568_s25] sm:$0xff] %vm456_vm1, %v515_v39 }
 0x2fc   : > { %v503_v41 = vsel %vm456_vm1, %v502_v40, 0.0 }
 0x2fd   : > { %504 = vadd.xlane.f32.xlu1 %v503_v41 }
 0x301   : > { %525 = vadd.xlane.f32.xlu1 %v524_v43 }
 0x38a   : > { %v505_v44 = vpop.xlane.xlu1 %504 }
 0x38b   : > { %v506_v45 = vrot.slane %v505_v44, 4 }
 0x38d   : > { %v507_v46 = vadd.f32 %v506_v45, %v505_v44 }
 0x38e   : > { %v526_v47 = vpop.xlane.xlu1 %525 }
 0x38f   : > { %v508_v48 = vrot.slane %v507_v46, 2  ;;  %939 = vrcp.f32 %v526_v47 }
 0x391   : > { %v509_v49 = vadd.f32 %v508_v48, %v507_v46 }
 0x393   : > { %v510_v50 = vrot.slane %v509_v49, 1 }
 0x395   : > { %v511_v51 = vadd.f32 %v510_v50, %v509_v49 }
 0x397   : > { %v512_v52 = vsub.f32 0.0, %v511_v51 }
 0x399   : > { %v940_v53 = vpop.eup %939  ;;  %514 = vst.msk [vmem:[%s445_s9] sm:$0x1] %vm513_vm4, %v512_v52 }
 0x39a   : > { %v528_v54 = vmul.f32 %v940_v53, %v938_v42 }
 0x39c   : > { %v529_v55 = vsel %vm499_vm3, %v528_v54, 0.0 }
 0x39d   : > { %530 = vst.msk [vmem:[%s1570_s15] sm:$0xff] %vm456_vm1, %v529_v55 }
 0x39e PF: > { %s775_s26 = sshll.u32 %s1183_s16, 7  ;;  %s1760_s17 = sld [smem:[#allocation31_spill]] }
 0x39f   : > { %s553_s21 = sshll.u32 %s1568_s25, 4  ;;  %s532_s9 = scalar_lea.sflag [#allocation8], %s1549_s22  ;;  %s554_s21 = int_to_ptr.vmem [resolvable:$true] %s553_s21 }
 0x3a0   : > { %s1011_s24 = scalar_lea.vmem %s554_s21, 128  ;;  %p1762_p4 = scmp.ne.s32.totalorder %s1741_s3, 0 }
 0x3a1   : > { %p1012_p13 = scmp.ne.s32.totalorder %s554_s21, %s1011_s24  ;;  %s1204_s5 = smov [#allocation11]  }
 0x3a2   : > { %s1015_s12 = sshll.u32 %s1204_s5, 4  ;;  %s1016_s12 = int_to_ptr.vmem [resolvable:$false] %s1015_s12 }
 0x3a3   : > { %p1013_p7 = pnand %p1012_p13, %p1762_p4  ;;  %s1017_s27 = scalar_lea.vmem %s1016_s12, 256 }
 0x3a4   : > { %s1761_s28 = smov %s1760_s17  ;;  %s1607_s4 = scalar_lea.hbm %s1760_s17, %s775_s26 }
 0x3a5   : > { %p1014_p2 = pneg %p1013_p7  ;;  %p1018_p12 = scmp.lt.s32.totalorder %s554_s21, %s1016_s12 }
 0x3a6   : > { %p1019_p10 = scmp.lt.s32.totalorder %s1017_s27, %s1011_s24 }
 0x3a8   : > { %p1020_p8 = por %p1019_p10, %p1018_p12 }
 0x3aa   : > { %p1021_p11 = pnand %p1020_p8, %p1014_p2 }
 0x3ac   : > { %1024 = shalt.err (!%p1021_p11)
}
 0x3ad   : > { %s1025_s25 = scalar_lea.hbm %s1607_s4, 128  ;;  %s1029_s10 = scalar_lea.hbm %s1761_s28, 512 }
 0x3ae   : > { %p1026_p6 = scmp.ne.s32.totalorder %s1607_s4, %s1025_s25  ;;  %p1030_p5 = scmp.lt.u32.totalorder %s1607_s4, %s1761_s28 }
 0x3af   : > { %p1031_p0 = scmp.lt.u32.totalorder %s1029_s10, %s1025_s25  ;;  %p1033_p13 = scmp.lt.u32.totalorder %s1025_s25, %s1607_s4 }
 0x3b0   : > { %p1027_p3 = pnand %p1026_p6, %p1762_p4 }
 0x3b1   : > { %p1032_p9 = por %p1031_p0, %p1030_p5 }
 0x3b2   : > { %p1028_p1 = pneg %p1027_p3 }
 0x3b3   : > { %p1034_p7 = por %p1033_p13, %p1032_p9 }
 0x3b5   : > { %p1035_p2 = pnand %p1034_p7, %p1028_p1 }
 0x3b7   : > { %1038 = shalt.err (!%p1035_p2)
}
 0x3b8   : > { %785 = dma.vmem_to_hbm [thread:$0]  (%p1762_p4), %s554_s21, 128, %s1607_s4, %s532_s9  }
 0x3b9   : > { %s1763_s12 = sld [smem:[#allocation32_spill]]  ;;  %s566_s20 = sshll.u32 %s1570_s15, 4  ;;  %s567_s20 = int_to_ptr.vmem [resolvable:$true] %s566_s20 }
 0x3ba   : > { %s537_s25 = scalar_lea.sflag [#allocation13], %s1549_s22  ;;  %s1039_s10 = scalar_lea.vmem %s567_s20, 128 }
 0x3bb   : > { %p1040_p12 = scmp.ne.s32.totalorder %s567_s20, %s1039_s10  ;;  %s1205_s30 = smov [#allocation12]  }
 0x3bc   : > { %s1043_s17 = sshll.u32 %s1205_s30, 4  ;;  %s1044_s17 = int_to_ptr.vmem [resolvable:$false] %s1043_s17 }
 0x3bd   : > { %p1041_p10 = pnand %p1040_p12, %p1762_p4  ;;  %s1045_s1 = scalar_lea.vmem %s1044_s17, 256 }
 0x3be   : > { %p1046_p11 = scmp.lt.s32.totalorder %s567_s20, %s1044_s17  ;;  %p1047_p6 = scmp.lt.s32.totalorder %s1045_s1, %s1039_s10 }
 0x3bf   : > { %s1764_s27 = smov %s1763_s12  ;;  %s1633_s23 = scalar_lea.hbm %s1763_s12, %s775_s26 }
 0x3c0   : > { %p1042_p8 = pneg %p1041_p10  ;;  %p1048_p3 = por %p1047_p6, %p1046_p11 }
 0x3c2   : > { %p1049_p1 = pnand %p1048_p3, %p1042_p8 }
 0x3c4   : > { %1052 = shalt.err (!%p1049_p1)
}
 0x3c5   : > { %s1053_s16 = scalar_lea.hbm %s1633_s23, 128  ;;  %s1057_s26 = scalar_lea.hbm %s1764_s27, 512 }
 0x3c6   : > { %p1054_p5 = scmp.ne.s32.totalorder %s1633_s23, %s1053_s16  ;;  %p1058_p13 = scmp.lt.u32.totalorder %s1633_s23, %s1764_s27 }
 0x3c7   : > { %p1059_p7 = scmp.lt.u32.totalorder %s1057_s26, %s1053_s16  ;;  %p1061_p12 = scmp.lt.u32.totalorder %s1053_s16, %s1633_s23 }
 0x3c8   : > { %p1055_p0 = pnand %p1054_p5, %p1762_p4 }
 0x3c9   : > { %p1060_p2 = por %p1059_p7, %p1058_p13 }
 0x3ca   : > { %p1056_p9 = pneg %p1055_p0 }
 0x3cb   : > { %p1062_p10 = por %p1061_p12, %p1060_p2 }
 0x3cd   : > { %p1063_p8 = pnand %p1062_p10, %p1056_p9 }
 0x3cf   : > { %1066 = shalt.err (!%p1063_p8)
}
 0x3d0   : > { %786 = dma.vmem_to_hbm [thread:$0]  (%p1762_p4), %s567_s20, 128, %s1633_s23, %s537_s25  }
 0x3d1 PF: > { %s1765_s1 = sld [smem:[#allocation28_spill]]  ;;  %p806_p11 = scmp.ge.s32.totalorder %s1195_s19, 2 }
 0x3d2   : > { %s581_s9 = sand.u32 1, %s1143_s7  }
 0x3d3   : > { %s582_s24 = scalar_lea.sflag [#allocation8], %s581_s9 }
 0x3d7   : > { %p1766_p6 = scmp.ne.s32.totalorder %s1765_s1, 0 }
 0x3d9   : > { %p799_p3 = pnand %p806_p11, %p1766_p6 }
 0x3db   : > { %1134 = dma.done.wait (!%p799_p3), %s582_s24, 128  }
 0x3dc   : > { %1136 = vsyncadd (!%p799_p3), %s582_s24, 4294967168  ;;  %s591_s5 = scalar_lea.sflag [#allocation13], %s581_s9 }
 0x3dd   : > { %1138 = dma.done.wait (!%p799_p3), %s591_s5, 128  }
 0x3de   : > { %1140 = vsyncadd (!%p799_p3), %s591_s5, 4294967168  ;;  %s33_s19 = sadd.s32 1, %s1195_s19   ;;  %s1768_s12 = sld [smem:[#allocation21_spill]] }
 0x3df   : > { %p1659_p1 = scmp.ge.s32.totalorder %s33_s19, 14   ;;  %s1769_s9 = sld [smem:[#allocation27_spill]] }
 0x3e0   : > { %s1770_s23 = sld [smem:[#allocation26_spill]]  ;;  %s1771_s15 = sld [smem:[#allocation23_spill]] }
 0x3e1   : > { %s1772_s17 = sld [smem:[#allocation24_spill]]  ;;  %s1773_s20 = sld [smem:[#allocation25_spill]] }
 0x3e2   : > { %s1774_s7 = smov %s1147_s8  ;;  %s1776_s10 = smov %s1159_s0 }
 0x3e3   : > { %s1777_s0 = smov %s1163_s11  ;;  %s1782_s16 = smov %s1191_s18 }
 0x3e4   : > { %s1775_s8 = smov %s1768_s12  ;;  %s1779_s12 = smov %s1171_s13 }
 0x3e5   : > { %s1780_s13 = smov %s1175_s14  ;;  %s1781_s14 = smov %s1421_s29 }
 0x3e6   : > { %s1778_s11 = smov %s1770_s23  ;;  %32 = sbr.rel (!%p1659_p1) target bundleno = 27 (0x1b), region = 130 }
 0x3e7   : > { %s1783_s18 = smov %s1773_s20 }
 0x3ed   :  { %602 = vsyncpa [#allocation7], 1 }
 0x3ee   :  { %604 = vsyncpa [#allocation7 + $0x1], 1 }
 0x3ef   :  { %605 = vsyncpa [#allocation10], 1 }
 0x3f0   :  { %607 = vsyncpa [#allocation10 + $0x1], 1 }
 0x3f1   :  { %608 = vsyncpa [#allocation8], 1 }
 0x3f2   :  { %610 = vsyncpa [#allocation8 + $0x1], 1 }
 0x3f3   :  { %611 = vsyncpa [#allocation13], 1 }
 0x3f4   :  { %613 = vsyncpa [#allocation13 + $0x1], 1 }

</bundles_post_ra>
